<compile_context>
chip_gen: v5e
topology: v5e:2x2
jax: 0.10.0
libtpu: 0.0.40
codegen_flags: <defaults>
</compile_context>

<pallas_src>
import functools

import jax
import jax.numpy as jnp
from jax import lax
from jax.experimental import pallas as pl
from jax.experimental.pallas import tpu as pltpu

GAMMA = 1.2
IGNORE_INDEX = 0
ALPHA = (2.38, 40.0, 3.03, 27.77, 10.27, 15.24, 55.0)   # per-class weights, C=7
_LANES = 128


def _focal_kernel(probs_ref, tgt_ref, sum_ref, cnt_ref, sum_acc, cnt_acc,
                  *, rows, tile_rows, tiles_per_chunk):
    """One (image, pixel-chunk, row-tile) step of the focal-loss reduction.

    probs_ref : (1, C, TR, 128) f32/bf16  softmax probabilities
    tgt_ref   : (1, 1, TR, 128) i32       class labels
    sum_ref   : (1, 1, 128)     f32       per-(image,chunk) loss-sum slot
    cnt_ref   : (1, 1, 128)     f32       per-(image,chunk) valid-pixel count
    sum_acc   : (TR, 128)       f32       VMEM elementwise accumulator
    cnt_acc   : (TR, 128)       f32       VMEM elementwise accumulator
    """
    cch = pl.program_id(1)
    j = pl.program_id(2)
    num_classes = probs_ref.shape[1]

    @pl.when(j == 0)
    def _():
        sum_acc[...] = jnp.zeros(sum_acc.shape, jnp.float32)
        cnt_acc[...] = jnp.zeros(cnt_acc.shape, jnp.float32)

    probs = probs_ref[0].astype(jnp.float32)            # (C, TR, 128)
    tgt = tgt_ref[0, 0]                                  # (TR, 128) int32

    # One-hot over the leading class axis -> reductions are plain VPU adds.
    cls = lax.broadcasted_iota(jnp.int32, probs.shape, 0)
    onehot = (cls == tgt[None, :, :]).astype(jnp.float32)        # (C, TR, 128)

    p_t = jnp.sum(probs * onehot, axis=0)                        # (TR, 128)
    p_t = jnp.clip(p_t, 1e-10, 1.0)
    ce = -jnp.log(p_t)                                           # 1 log / pixel
    focal = jnp.power(jnp.maximum(1.0 - p_t, 0.0), GAMMA)        # p_t == exp(-ce)

    # Per-pixel alpha via the same one-hot (scalar constants, VPU only).
    alpha_w = onehot[0] * ALPHA[0]
    for k in range(1, num_classes):
        alpha_w = alpha_w + onehot[k] * ALPHA[k]

    loss = alpha_w * focal * ce
    base_valid = tgt != IGNORE_INDEX

    tile_start = (cch * tiles_per_chunk + j) * tile_rows
    is_ragged = tile_start + tile_rows > rows

    @pl.when(jnp.logical_not(is_ragged))
    def _():
        # Interior tiles: no row-range mask needed.
        sum_acc[...] += jnp.where(base_valid, loss, 0.0)
        cnt_acc[...] += base_valid.astype(jnp.float32)

    @pl.when(is_ragged)
    def _():
        # Boundary tile: also mask rows beyond the real pixel range.  jnp.where
        # (select, not multiply) discards any NaN from the undefined tail data.
        row = tile_start + lax.broadcasted_iota(jnp.int32, tgt.shape, 0)
        valid = jnp.logical_and(base_valid, row < rows)
        sum_acc[...] += jnp.where(valid, loss, 0.0)
        cnt_acc[...] += valid.astype(jnp.float32)

    @pl.when(j == pl.num_programs(2) - 1)
    def _():
        # One cross-lane/sublane reduce per (image, chunk); lane-dense store.
        sum_ref[...] = jnp.full(sum_ref.shape, jnp.sum(sum_acc[...]), jnp.float32)
        cnt_ref[...] = jnp.full(cnt_ref.shape, jnp.sum(cnt_acc[...]), jnp.float32)


def _choose_tile_rows(rows, tile_pixels):
    """Largest sublane-aligned row tile that is legal for this image size."""
    desired = max(1, tile_pixels // _LANES)
    if rows <= desired:
        return rows                        # full-dim block: always layout-legal
    return max(8, (desired // 8) * 8)      # multiple of 8 sublanes


@functools.partial(jax.jit, static_argnames=("tile_pixels",))
def focal_loss(softmax_probs_nchw, targets, tile_pixels=65536):
    """softmax_probs_nchw: (N, C, H, W) f32/bf16 probs; targets: (N, H, W) int."""
    n, c, h, w = softmax_probs_nchw.shape
    assert c == len(ALPHA), "alpha table must match number of classes"
    hw = h * w

    probs = softmax_probs_nchw                      # no wrapper cast (kernel upcasts)
    tgt = targets if targets.dtype == jnp.int32 else targets.astype(jnp.int32)

    # Pixels go on the 128-lane axis; rows of 128 pixels on sublanes.
    hw_pad = ((hw + _LANES - 1) // _LANES) * _LANES
    if hw_pad != hw:
        # Rare path (H*W not a multiple of 128): pad; padded targets get
        # IGNORE_INDEX so they never contribute.
        # TODO(synk): avoid the probs padding pass by masking lanes in-kernel.
        probs = jnp.pad(probs.reshape(n, c, hw),
                        ((0, 0), (0, 0), (0, hw_pad - hw)), constant_values=1.0)
        tgt = jnp.pad(tgt.reshape(n, hw),
                      ((0, 0), (0, hw_pad - hw)), constant_values=IGNORE_INDEX)
    rows = hw_pad // _LANES

    probs = probs.reshape(n, c, rows, _LANES)       # free row-major split
    tgt = tgt.reshape(n, 1, rows, _LANES)

    tile_rows = _choose_tile_rows(rows, tile_pixels)
    row_blocks = pl.cdiv(rows, tile_rows)

    # v7x megacore: when N alone can't feed both TensorCores, also split the
    # pixel axis into a second "parallel" chunk axis (neutral on v5e/v6e).
    n_chunks = 2 if (n % 2 == 1 and row_blocks >= 2 and row_blocks % 2 == 0) else 1
    tiles_per_chunk = row_blocks // n_chunks

    kernel = functools.partial(_focal_kernel, rows=rows, tile_rows=tile_rows,
                               tiles_per_chunk=tiles_per_chunk)

    p_total = n * hw
    itemsize = jnp.dtype(softmax_probs_nchw.dtype).itemsize
    cost = pl.CostEstimate(
        flops=int(p_total * (3 * c + 20)),
        transcendentals=int(3 * p_total),
        bytes_accessed=int(p_total * (c * itemsize + 4)
                           + 2 * n * n_chunks * _LANES * 4),
    )

    loss_sum, valid_cnt = pl.pallas_call(
        kernel,
        out_shape=(
            jax.ShapeDtypeStruct((n * n_chunks, 1, _LANES), jnp.float32),
            jax.ShapeDtypeStruct((n * n_chunks, 1, _LANES), jnp.float32),
        ),
        grid_spec=pltpu.PrefetchScalarGridSpec(
            num_scalar_prefetch=0,
            grid=(n, n_chunks, tiles_per_chunk),
            in_specs=[
                pl.BlockSpec((1, c, tile_rows, _LANES),
                             lambda i, cc, j: (i, 0, cc * tiles_per_chunk + j, 0)),
                pl.BlockSpec((1, 1, tile_rows, _LANES),
                             lambda i, cc, j: (i, 0, cc * tiles_per_chunk + j, 0)),
            ],
            out_specs=[
                pl.BlockSpec((1, 1, _LANES),
                             lambda i, cc, j: (i * n_chunks + cc, 0, 0)),
                pl.BlockSpec((1, 1, _LANES),
                             lambda i, cc, j: (i * n_chunks + cc, 0, 0)),
            ],
            scratch_shapes=[
                pltpu.VMEM((tile_rows, _LANES), jnp.float32),
                pltpu.VMEM((tile_rows, _LANES), jnp.float32),
            ],
        ),
        compiler_params=pltpu.CompilerParams(
            dimension_semantics=("parallel", "parallel", "arbitrary")),
        cost_estimate=cost,
    )(probs, tgt)

    # mean over valid pixels (matches loss[valid_mask].mean()); NaN when no
    # pixel is valid — identical to torch .mean() over an empty selection.
    total_sum = jnp.sum(loss_sum[:, 0, 0])
    total_cnt = jnp.sum(valid_cnt[:, 0, 0])
    return (total_sum / total_cnt).astype(jnp.float32)


def _reference(softmax_probs_nchw, targets):
    """Pure-JAX reference mirroring the PyTorch forward."""
    probs = jnp.clip(softmax_probs_nchw.astype(jnp.float32), 1e-10, 1.0)
    logp = jnp.log(probs)
    t = targets.astype(jnp.int32)
    logp_t = jnp.take_along_axis(logp, t[:, None, :, :], axis=1)[:, 0]
    ce = jnp.where(t == IGNORE_INDEX, 0.0, -logp_t)
    pt = jnp.exp(-ce)
    focal = jnp.maximum(1.0 - pt, 0.0) ** GAMMA
    alpha = jnp.asarray(ALPHA, jnp.float32)
    loss = alpha[t] * focal * ce
    valid = t != IGNORE_INDEX
    return jnp.sum(jnp.where(valid, loss, 0.0)) / jnp.sum(valid)


if __name__ == "__main__":
    key = jax.random.PRNGKey(0)
    k1, k2 = jax.random.split(key)

    N, C, H, W = 2, 7, 16, 16
    logits = jax.random.normal(k1, (N, C, H, W), dtype=jnp.float32)
    softmax_probs = jax.nn.softmax(logits, axis=1)          # NCHW probabilities
    targets = jax.random.randint(k2, (N, H, W), 0, C, dtype=jnp.int32)

    out = jax.block_until_ready(focal_loss(softmax_probs, targets))
    ref = jax.block_until_ready(_reference(softmax_probs, targets))
    assert jnp.allclose(out, ref, rtol=1e-4, atol=1e-5), (out, ref)

    print("KERNEL_OK")
</pallas_src>

<mosaic_0001>
module attributes {stable_mosaic.version = 11 : i64} {
  func.func @_focal_kernel(%arg0: i32, %arg1: i32, %arg2: i32, %arg3: memref<1x7x2x128xf32, #tpu.memory_space<vmem>>, %arg4: memref<1x1x2x128xi32, #tpu.memory_space<vmem>>, %arg5: memref<1x1x128xf32, #tpu.memory_space<vmem>>, %arg6: memref<1x1x128xf32, #tpu.memory_space<vmem>>, %arg7: memref<2x128xf32, #tpu.memory_space<vmem>>, %arg8: memref<2x128xf32, #tpu.memory_space<vmem>>) attributes {dimension_semantics = [#tpu.dimension_semantics<parallel>, #tpu.dimension_semantics<parallel>, #tpu.dimension_semantics<arbitrary>], iteration_bounds = array<i64: 2, 1, 1>, scalar_prefetch = 0 : i64, scratch_operands = 2 : i64, tpu.core_type = #tpu.core_type<tc>, window_params = [{transform_indices = @transform_0, window_bounds = array<i64: 1, 7, 2, 128>}, {transform_indices = @transform_1, window_bounds = array<i64: 1, 1, 2, 128>}, {transform_indices = @transform_2, window_bounds = array<i64: 1, 1, 128>}, {transform_indices = @transform_3, window_bounds = array<i64: 1, 1, 128>}]} {
    %c0_i32 = arith.constant 0 : i32
    %0 = arith.cmpi eq, %arg2, %c0_i32 : i32
    %1 = arith.extui %0 : i1 to i32
    %c0_i32_0 = arith.constant 0 : i32
    %2 = arith.cmpi ne, %1, %c0_i32_0 : i32
    scf.if %2 {
      %cst_28 = arith.constant 0.000000e+00 : f32
      %79 = vector.broadcast %cst_28 : f32 to vector<2x128xf32>
      %c0_29 = arith.constant 0 : index
      %c0_30 = arith.constant 0 : index
      %80 = vector.load %arg7[%c0_29, %c0_30] : memref<2x128xf32, #tpu.memory_space<vmem>>, vector<2x128xf32>
      tpu.vector_store %arg7[%c0_29, %c0_30], %79 {strides = array<i32>} : memref<2x128xf32, #tpu.memory_space<vmem>>, vector<2x128xf32>,
      %cst_31 = arith.constant 0.000000e+00 : f32
      %81 = vector.broadcast %cst_31 : f32 to vector<2x128xf32>
      %c0_32 = arith.constant 0 : index
      %c0_33 = arith.constant 0 : index
      %82 = vector.load %arg8[%c0_32, %c0_33] : memref<2x128xf32, #tpu.memory_space<vmem>>, vector<2x128xf32>
      tpu.vector_store %arg8[%c0_32, %c0_33], %81 {strides = array<i32>} : memref<2x128xf32, #tpu.memory_space<vmem>>, vector<2x128xf32>,
    } else {
    }
    %c0 = arith.constant 0 : index
    %c0_1 = arith.constant 0 : index
    %c0_2 = arith.constant 0 : index
    %c0_3 = arith.constant 0 : index
    %3 = vector.load %arg3[%c0, %c0_1, %c0_2, %c0_3] : memref<1x7x2x128xf32, #tpu.memory_space<vmem>>, vector<1x7x2x128xf32>
    %4 = vector.shape_cast %3 : vector<1x7x2x128xf32> to vector<7x2x128xf32>
    %c0_4 = arith.constant 0 : index
    %c0_5 = arith.constant 0 : index
    %c0_6 = arith.constant 0 : index
    %c0_7 = arith.constant 0 : index
    %5 = vector.load %arg4[%c0_4, %c0_5, %c0_6, %c0_7] : memref<1x1x2x128xi32, #tpu.memory_space<vmem>>, vector<1x1x2x128xi32>
    %6 = vector.shape_cast %5 : vector<1x1x2x128xi32> to vector<2x128xi32>
    %7 = tpu.iota {dimensions = array<i32: 0>} : vector<7x2x128xi32>
    %8 = vector.shape_cast %6 : vector<2x128xi32> to vector<1x2x128xi32>
    %9 = vector.broadcast %8 : vector<1x2x128xi32> to vector<7x2x128xi32>
    %10 = arith.cmpi eq, %7, %9 : vector<7x2x128xi32>
    %11 = arith.extui %10 : vector<7x2x128xi1> to vector<7x2x128xi32>
    %12 = arith.sitofp %11 : vector<7x2x128xi32> to vector<7x2x128xf32>
    %13 = arith.mulf %4, %12 : vector<7x2x128xf32>
    %cst = arith.constant dense<0.000000e+00> : vector<2x128xf32>
    %14 = vector.multi_reduction <add>, %13, %cst [0] : vector<7x2x128xf32> to vector<2x128xf32>
    %cst_8 = arith.constant 1.000000e-10 : f32
    %cst_9 = arith.constant 1.000000e+00 : f32
    %15 = vector.broadcast %cst_8 : f32 to vector<2x128xf32>
    %16 = arith.maximumf %15, %14 : vector<2x128xf32>
    %17 = vector.broadcast %cst_9 : f32 to vector<2x128xf32>
    %18 = arith.minimumf %17, %16 : vector<2x128xf32>
    %19 = math.log %18 : vector<2x128xf32>
    %cst_10 = arith.constant 0.000000e+00 : f32
    %20 = vector.broadcast %cst_10 : f32 to vector<2x128xf32>
    %21 = arith.subf %20, %19 : vector<2x128xf32>
    %cst_11 = arith.constant 1.000000e+00 : f32
    %22 = vector.broadcast %cst_11 : f32 to vector<2x128xf32>
    %23 = arith.subf %22, %18 : vector<2x128xf32>
    %cst_12 = arith.constant 0.000000e+00 : f32
    %24 = vector.broadcast %cst_12 : f32 to vector<2x128xf32>
    %25 = arith.maximumf %23, %24 : vector<2x128xf32>
    %cst_13 = arith.constant 1.200000e+00 : f32
    %26 = vector.broadcast %cst_13 : f32 to vector<2x128xf32>
    %27 = math.powf %25, %26 : vector<2x128xf32>
    %28 = vector.extract_strided_slice %12 {offsets = [0, 0, 0], sizes = [1, 2, 128], strides = [1, 1, 1]} : vector<7x2x128xf32> to vector<1x2x128xf32>
    %29 = vector.shape_cast %28 : vector<1x2x128xf32> to vector<2x128xf32>
    %cst_14 = arith.constant 2.380000e+00 : f32
    %30 = vector.broadcast %cst_14 : f32 to vector<2x128xf32>
    %31 = arith.mulf %29, %30 : vector<2x128xf32>
    %32 = vector.extract_strided_slice %12 {offsets = [1, 0, 0], sizes = [1, 2, 128], strides = [1, 1, 1]} : vector<7x2x128xf32> to vector<1x2x128xf32>
    %33 = vector.shape_cast %32 : vector<1x2x128xf32> to vector<2x128xf32>
    %cst_15 = arith.constant 4.000000e+01 : f32
    %34 = vector.broadcast %cst_15 : f32 to vector<2x128xf32>
    %35 = arith.mulf %33, %34 : vector<2x128xf32>
    %36 = arith.addf %31, %35 : vector<2x128xf32>
    %37 = vector.extract_strided_slice %12 {offsets = [2, 0, 0], sizes = [1, 2, 128], strides = [1, 1, 1]} : vector<7x2x128xf32> to vector<1x2x128xf32>
    %38 = vector.shape_cast %37 : vector<1x2x128xf32> to vector<2x128xf32>
    %cst_16 = arith.constant 3.030000e+00 : f32
    %39 = vector.broadcast %cst_16 : f32 to vector<2x128xf32>
    %40 = arith.mulf %38, %39 : vector<2x128xf32>
    %41 = arith.addf %36, %40 : vector<2x128xf32>
    %42 = vector.extract_strided_slice %12 {offsets = [3, 0, 0], sizes = [1, 2, 128], strides = [1, 1, 1]} : vector<7x2x128xf32> to vector<1x2x128xf32>
    %43 = vector.shape_cast %42 : vector<1x2x128xf32> to vector<2x128xf32>
    %cst_17 = arith.constant 2.777000e+01 : f32
    %44 = vector.broadcast %cst_17 : f32 to vector<2x128xf32>
    %45 = arith.mulf %43, %44 : vector<2x128xf32>
    %46 = arith.addf %41, %45 : vector<2x128xf32>
    %47 = vector.extract_strided_slice %12 {offsets = [4, 0, 0], sizes = [1, 2, 128], strides = [1, 1, 1]} : vector<7x2x128xf32> to vector<1x2x128xf32>
    %48 = vector.shape_cast %47 : vector<1x2x128xf32> to vector<2x128xf32>
    %cst_18 = arith.constant 1.027000e+01 : f32
    %49 = vector.broadcast %cst_18 : f32 to vector<2x128xf32>
    %50 = arith.mulf %48, %49 : vector<2x128xf32>
    %51 = arith.addf %46, %50 : vector<2x128xf32>
    %52 = vector.extract_strided_slice %12 {offsets = [5, 0, 0], sizes = [1, 2, 128], strides = [1, 1, 1]} : vector<7x2x128xf32> to vector<1x2x128xf32>
    %53 = vector.shape_cast %52 : vector<1x2x128xf32> to vector<2x128xf32>
    %cst_19 = arith.constant 1.524000e+01 : f32
    %54 = vector.broadcast %cst_19 : f32 to vector<2x128xf32>
    %55 = arith.mulf %53, %54 : vector<2x128xf32>
    %56 = arith.addf %51, %55 : vector<2x128xf32>
    %57 = vector.extract_strided_slice %12 {offsets = [6, 0, 0], sizes = [1, 2, 128], strides = [1, 1, 1]} : vector<7x2x128xf32> to vector<1x2x128xf32>
    %58 = vector.shape_cast %57 : vector<1x2x128xf32> to vector<2x128xf32>
    %cst_20 = arith.constant 5.500000e+01 : f32
    %59 = vector.broadcast %cst_20 : f32 to vector<2x128xf32>
    %60 = arith.mulf %58, %59 : vector<2x128xf32>
    %61 = arith.addf %56, %60 : vector<2x128xf32>
    %62 = arith.mulf %61, %27 : vector<2x128xf32>
    %63 = arith.mulf %62, %21 : vector<2x128xf32>
    %c0_i32_21 = arith.constant 0 : i32
    %64 = vector.broadcast %c0_i32_21 : i32 to vector<2x128xi32>
    %65 = arith.cmpi ne, %6, %64 : vector<2x128xi32>
    %c1_i32 = arith.constant 1 : i32
    %66 = arith.muli %arg1, %c1_i32 : i32
    %67 = arith.addi %66, %arg2 : i32
    %c2_i32 = arith.constant 2 : i32
    %68 = arith.muli %67, %c2_i32 : i32
    %c2_i32_22 = arith.constant 2 : i32
    %69 = arith.addi %68, %c2_i32_22 : i32
    %c2_i32_23 = arith.constant 2 : i32
    %70 = arith.cmpi sgt, %69, %c2_i32_23 : i32
    %true = arith.constant true
    %71 = arith.xori %70, %true : i1
    %72 = arith.extui %71 : i1 to i32
    %c0_i32_24 = arith.constant 0 : i32
    %73 = arith.cmpi ne, %72, %c0_i32_24 : i32
    scf.if %73 {
      %c0_28 = arith.constant 0 : index
      %c0_29 = arith.constant 0 : index
      %79 = vector.load %arg7[%c0_28, %c0_29] : memref<2x128xf32, #tpu.memory_space<vmem>>, vector<2x128xf32>
      %cst_30 = arith.constant 0.000000e+00 : f32
      %80 = vector.broadcast %cst_30 : f32 to vector<2x128xf32>
      %81 = arith.select %65, %63, %80 : vector<2x128xi1>, vector<2x128xf32>
      %82 = arith.addf %79, %81 : vector<2x128xf32>
      %c0_31 = arith.constant 0 : index
      %c0_32 = arith.constant 0 : index
      %83 = vector.load %arg7[%c0_31, %c0_32] : memref<2x128xf32, #tpu.memory_space<vmem>>, vector<2x128xf32>
      tpu.vector_store %arg7[%c0_31, %c0_32], %82 {strides = array<i32>} : memref<2x128xf32, #tpu.memory_space<vmem>>, vector<2x128xf32>,
      %c0_33 = arith.constant 0 : index
      %c0_34 = arith.constant 0 : index
      %84 = vector.load %arg8[%c0_33, %c0_34] : memref<2x128xf32, #tpu.memory_space<vmem>>, vector<2x128xf32>
      %85 = arith.extui %65 : vector<2x128xi1> to vector<2x128xi32>
      %86 = arith.sitofp %85 : vector<2x128xi32> to vector<2x128xf32>
      %87 = arith.addf %84, %86 : vector<2x128xf32>
      %c0_35 = arith.constant 0 : index
      %c0_36 = arith.constant 0 : index
      %88 = vector.load %arg8[%c0_35, %c0_36] : memref<2x128xf32, #tpu.memory_space<vmem>>, vector<2x128xf32>
      tpu.vector_store %arg8[%c0_35, %c0_36], %87 {strides = array<i32>} : memref<2x128xf32, #tpu.memory_space<vmem>>, vector<2x128xf32>,
    } else {
    }
    %74 = arith.extui %70 : i1 to i32
    %c0_i32_25 = arith.constant 0 : i32
    %75 = arith.cmpi ne, %74, %c0_i32_25 : i32
    scf.if %75 {
      %79 = tpu.iota {dimensions = array<i32: 0>} : vector<2x128xi32>
      %80 = vector.broadcast %68 : i32 to vector<2x128xi32>
      %81 = arith.addi %80, %79 : vector<2x128xi32>
      %c2_i32_28 = arith.constant 2 : i32
      %82 = vector.broadcast %c2_i32_28 : i32 to vector<2x128xi32>
      %83 = arith.cmpi slt, %81, %82 : vector<2x128xi32>
      %84 = arith.andi %65, %83 : vector<2x128xi1>
      %c0_29 = arith.constant 0 : index
      %c0_30 = arith.constant 0 : index
      %85 = vector.load %arg7[%c0_29, %c0_30] : memref<2x128xf32, #tpu.memory_space<vmem>>, vector<2x128xf32>
      %cst_31 = arith.constant 0.000000e+00 : f32
      %86 = vector.broadcast %cst_31 : f32 to vector<2x128xf32>
      %87 = arith.select %84, %63, %86 : vector<2x128xi1>, vector<2x128xf32>
      %88 = arith.addf %85, %87 : vector<2x128xf32>
      %c0_32 = arith.constant 0 : index
      %c0_33 = arith.constant 0 : index
      %89 = vector.load %arg7[%c0_32, %c0_33] : memref<2x128xf32, #tpu.memory_space<vmem>>, vector<2x128xf32>
      tpu.vector_store %arg7[%c0_32, %c0_33], %88 {strides = array<i32>} : memref<2x128xf32, #tpu.memory_space<vmem>>, vector<2x128xf32>,
      %c0_34 = arith.constant 0 : index
      %c0_35 = arith.constant 0 : index
      %90 = vector.load %arg8[%c0_34, %c0_35] : memref<2x128xf32, #tpu.memory_space<vmem>>, vector<2x128xf32>
      %91 = arith.extui %84 : vector<2x128xi1> to vector<2x128xi32>
      %92 = arith.sitofp %91 : vector<2x128xi32> to vector<2x128xf32>
      %93 = arith.addf %90, %92 : vector<2x128xf32>
      %c0_36 = arith.constant 0 : index
      %c0_37 = arith.constant 0 : index
      %94 = vector.load %arg8[%c0_36, %c0_37] : memref<2x128xf32, #tpu.memory_space<vmem>>, vector<2x128xf32>
      tpu.vector_store %arg8[%c0_36, %c0_37], %93 {strides = array<i32>} : memref<2x128xf32, #tpu.memory_space<vmem>>, vector<2x128xf32>,
    } else {
    }
    %c0_i32_26 = arith.constant 0 : i32
    %76 = arith.cmpi eq, %arg2, %c0_i32_26 : i32
    %77 = arith.extui %76 : i1 to i32
    %c0_i32_27 = arith.constant 0 : i32
    %78 = arith.cmpi ne, %77, %c0_i32_27 : i32
    scf.if %78 {
      %c0_28 = arith.constant 0 : index
      %c0_29 = arith.constant 0 : index
      %79 = vector.load %arg7[%c0_28, %c0_29] : memref<2x128xf32, #tpu.memory_space<vmem>>, vector<2x128xf32>
      %80 = vector.shape_cast %79 : vector<2x128xf32> to vector<1x2x128xf32>
      %cst_30 = arith.constant dense<0.000000e+00> : vector<1xf32>
      %81 = vector.multi_reduction <add>, %80, %cst_30 [1, 2] : vector<1x2x128xf32> to vector<1xf32>
      %82 = vector.shape_cast %81 : vector<1xf32> to vector<1x1x1xf32>
      %83 = vector.extract %82[0, 0, 0] : f32 from vector<1x1x1xf32>
      %84 = vector.broadcast %83 : f32 to vector<1x1x128xf32>
      %c0_31 = arith.constant 0 : index
      %c0_32 = arith.constant 0 : index
      %c0_33 = arith.constant 0 : index
      %85 = vector.load %arg5[%c0_31, %c0_32, %c0_33] : memref<1x1x128xf32, #tpu.memory_space<vmem>>, vector<1x1x128xf32>
      tpu.vector_store %arg5[%c0_31, %c0_32, %c0_33], %84 {strides = array<i32>} : memref<1x1x128xf32, #tpu.memory_space<vmem>>, vector<1x1x128xf32>,
      %c0_34 = arith.constant 0 : index
      %c0_35 = arith.constant 0 : index
      %86 = vector.load %arg8[%c0_34, %c0_35] : memref<2x128xf32, #tpu.memory_space<vmem>>, vector<2x128xf32>
      %87 = vector.shape_cast %86 : vector<2x128xf32> to vector<1x2x128xf32>
      %cst_36 = arith.constant dense<0.000000e+00> : vector<1xf32>
      %88 = vector.multi_reduction <add>, %87, %cst_36 [1, 2] : vector<1x2x128xf32> to vector<1xf32>
      %89 = vector.shape_cast %88 : vector<1xf32> to vector<1x1x1xf32>
      %90 = vector.extract %89[0, 0, 0] : f32 from vector<1x1x1xf32>
      %91 = vector.broadcast %90 : f32 to vector<1x1x128xf32>
      %c0_37 = arith.constant 0 : index
      %c0_38 = arith.constant 0 : index
      %c0_39 = arith.constant 0 : index
      %92 = vector.load %arg6[%c0_37, %c0_38, %c0_39] : memref<1x1x128xf32, #tpu.memory_space<vmem>>, vector<1x1x128xf32>
      tpu.vector_store %arg6[%c0_37, %c0_38, %c0_39], %91 {strides = array<i32>} : memref<1x1x128xf32, #tpu.memory_space<vmem>>, vector<1x1x128xf32>,
    } else {
    }
    return
  }
  func.func @transform_0(%arg0: i32, %arg1: i32, %arg2: i32) -> (i32, i32, i32, i32) {
    %c1_i32 = arith.constant 1 : i32
    %0 = arith.muli %arg1, %c1_i32 : i32
    %1 = arith.addi %0, %arg2 : i32
    %c0_i32 = arith.constant 0 : i32
    %c0_i32_0 = arith.constant 0 : i32
    %c0_i32_1 = arith.constant 0 : i32
    return %arg0, %c0_i32, %1, %c0_i32_0 : i32, i32, i32, i32
  }
  func.func @transform_1(%arg0: i32, %arg1: i32, %arg2: i32) -> (i32, i32, i32, i32) {
    %c1_i32 = arith.constant 1 : i32
    %0 = arith.muli %arg1, %c1_i32 : i32
    %1 = arith.addi %0, %arg2 : i32
    %c0_i32 = arith.constant 0 : i32
    %c0_i32_0 = arith.constant 0 : i32
    %c0_i32_1 = arith.constant 0 : i32
    return %arg0, %c0_i32, %1, %c0_i32_0 : i32, i32, i32, i32
  }
  func.func @transform_2(%arg0: i32, %arg1: i32, %arg2: i32) -> (i32, i32, i32) {
    %c1_i32 = arith.constant 1 : i32
    %0 = arith.muli %arg0, %c1_i32 : i32
    %1 = arith.addi %0, %arg1 : i32
    %c0_i32 = arith.constant 0 : i32
    %c0_i32_0 = arith.constant 0 : i32
    %c0_i32_1 = arith.constant 0 : i32
    return %1, %c0_i32, %c0_i32_0 : i32, i32, i32
  }
  func.func @transform_3(%arg0: i32, %arg1: i32, %arg2: i32) -> (i32, i32, i32) {
    %c1_i32 = arith.constant 1 : i32
    %0 = arith.muli %arg0, %c1_i32 : i32
    %1 = arith.addi %0, %arg1 : i32
    %c0_i32 = arith.constant 0 : i32
    %c0_i32_0 = arith.constant 0 : i32
    %c0_i32_1 = arith.constant 0 : i32
    return %1, %c0_i32, %c0_i32_0 : i32, i32, i32
  }
}

</mosaic_0001>

<bundles_post_ra>
// kernel: focal_loss.1
= control target key start
LH: loop header
LB: loop body
LE: loop exit
PB: predicated region body
PF: predicated region fallthrough
CT: control target
= control target key end

     0   :  { %s681_s12 = smov 0   ;;  %s683_s13 = smov 0   ;;  %s779_s0 = inlined_call_operand.vmem [shape: f32[2,7,2,128], index: 0, kind: input, shape index: {}]   ;;  %s780_s1 = inlined_call_operand.vmem [shape: s32[2,1,2,128], index: 1, kind: input, shape index: {}]   ;;  %s781_s2 = inlined_call_operand.vmem [shape: f32[2,1,128], index: 2, kind: output, shape index: {0}]   ;;  %s782_s3 = inlined_call_operand.vmem [shape: f32[2,1,128], index: 3, kind: output, shape index: {1}]  }
   0x1   :  { %s685_s14 = smov 0  }
   0x2 LB: > { %s33_s15 = sadd.s32 1, %s654_s13  ;;  %p517_p0 = scmp.ge.s32.totalorder %s658_s14, 1  ;;  %s658_s14 = sphi %s685_s14, %s14_s14   ;;  %s654_s13 = sphi %s683_s13, %s784_s13   ;;  %s650_s12 = sphi %s681_s12, %s783_s12  }
   0x3   : > { %p35_p1 = scmp.ge.s32.totalorder %s33_s15, 2  ;;  %p190_p2 = scmp.lt.s32.totalorder %s658_s14, 3 }
   0x5   : > { %s786_s15 = smov (%p35_p1, %s33_s15), 0  ;;  %p191_p3 = pnand %p517_p0, %p190_p2 }
   0x6   : > { %p230_p4 = scmp.lt.s32.totalorder (!%p191_p3), %s650_s12, 1 }
   0x7   : > { %194 = sbr.rel (%p191_p3) target bundleno = 304 (0x130), region = 28 }
   0xc   : > { %v660_v0 = vmov 0.0   ;;  %s788_s12 = smov (!%p230_p4, %s650_s12), 1  ;;  %vm300_vm6 = vcmask 1041408  }
   0xd   : > { %262 = vst [vmem:[#allocation2] sm:$0x3] %v660_v0  ;;  %s531_s16 = smul.u32 14, %s788_s12  ;;  %s519_s17 = sshll.u32 %s788_s12, 1 }
   0xe   : > { %263 = vst [vmem:[#allocation3] sm:$0x3] %v660_v0  ;;  %s246_s20 = scalar_lea.vmem %s780_s1, %s519_s17  ;;  %s251_s26 = scalar_lea.vmem %s781_s2, %s788_s12 }
   0xf   : > { %s237_s23 = scalar_lea.vmem %s779_s0, %s531_s16  ;;  %v711_v1 = vld [vmem:[%s246_s20] sm:$0x3]  ;;  %s256_s30 = scalar_lea.vmem %s782_s3, %s788_s12 }
  0x10   : > { %v264_v2 = vld [vmem:[%s237_s23] sm:$0x3]  ;;  %v265_v3 = vld [vmem:[%s237_s23 + $0x2] sm:$0x3]  ;;  %v266_v4 = vld [vmem:[%s237_s23 + $0x4] sm:$0x3] }
  0x11   : > { %vm272_vm0 = vcmp.eq.s32.totalorder %v711_v1, 0  ;;  %vm273_vm1 = vcmp.eq.s32.totalorder %v711_v1, 1  ;;  %vm274_vm2 = vcmp.eq.s32.totalorder %v711_v1, 2  ;;  %vm275_vm3 = vcmp.eq.s32.totalorder %v711_v1, 3  ;;  %v267_v5 = vld [vmem:[%s237_s23 + $0x6] sm:$0x3] }
  0x12   : > { %vm276_vm4 = vcmp.eq.s32.totalorder %v711_v1, 4  ;;  %vm277_vm5 = vcmp.eq.s32.totalorder %v711_v1, 5  ;;  %v520_v6 = vsel %vm272_vm0, 1.0, %v660_v0  ;;  %v268_v7 = vld [vmem:[%s237_s23 + $0x8] sm:$0x3]  ;;  %v521_v8 = vsel %vm273_vm1, 1.0, %v660_v0 }
  0x13   : > { %v522_v9 = vsel %vm274_vm2, 1.0, %v660_v0  ;;  %v523_v10 = vsel %vm275_vm3, 1.0, %v660_v0  ;;  %v524_v11 = vsel %vm276_vm4, 1.0, %v660_v0  ;;  %vm278_vm7 = vcmp.eq.s32.totalorder %v711_v1, 6  ;;  %v269_v14 = vld [vmem:[%s237_s23 + $0xa] sm:$0x3] }
  0x14   : > { %v293_v12 = vmul.f32 %v520_v6, %v264_v2  ;;  %v294_v13 = vmul.f32 %v521_v8, %v265_v3  ;;  %v525_v15 = vsel %vm277_vm5, 1.0, %v660_v0  ;;  %v295_v16 = vmul.f32 %v522_v9, %v266_v4  ;;  %v270_v21 = vld [vmem:[%s237_s23 + $0xc] sm:$0x3] }
  0x15   : > { %v296_v17 = vmul.f32 %v523_v10, %v267_v5  ;;  %v297_v18 = vmul.f32 %v524_v11, %v268_v7  ;;  %v526_v22 = vsel %vm278_vm7, 1.0, %v660_v0  ;;  %v298_v25 = vmul.f32 %v525_v15, %v269_v14 }
  0x16   : > { %v301_v19 = vsel %vm300_vm6, %v293_v12, 0.0  ;;  %v302_v20 = vsel %vm300_vm6, %v294_v13, 0.0  ;;  %v304_v24 = vsel %vm300_vm6, %v295_v16, 0.0  ;;  %v299_v28 = vmul.f32 %v526_v22, %v270_v21 }
  0x17   : > { %v303_v23 = vadd.f32 %v302_v20, %v301_v19  ;;  %v306_v26 = vsel %vm300_vm6, %v296_v17, 0.0  ;;  %v308_v29 = vsel %vm300_vm6, %v297_v18, 0.0  ;;  %v310_v31 = vsel %vm300_vm6, %v298_v25, 0.0 }
  0x18   : > { %v312_v33 = vsel %vm300_vm6, %v299_v28, 0.0  ;;  %v322_v46 = vmul.f32 2.38, %v520_v6  ;;  %v323_v47 = vmul.f32 40.0, %v521_v8  ;;  %v325_v52 = vmul.f32 3.03, %v522_v9 }
  0x19   : > { %v305_v27 = vadd.f32 %v304_v24, %v303_v23  ;;  %v327_v54 = vmul.f32 27.77, %v523_v10  ;;  %v329_v58 = vmul.f32 10.27, %v524_v11  ;;  %v331_v63 = vmul.f32 15.24, %v525_v15 }
  0x1a   : > { %v324_v51 = vadd.f32 %v323_v47, %v322_v46  ;;  %v333_v5 = vmul.f32 55.0, %v526_v22  ;;  %vm337_vm10 = vcmp.ne.s32.totalorder %v711_v1, 0  ;;  %v350_v24 = vld [vmem:[#allocation3] sm:$0x3] }
  0x1b   : > { %v307_v30 = vadd.f32 %v306_v26, %v305_v27  ;;  %v527_v25 = vsel %vm337_vm10, 1.0, %v660_v0 }
  0x1c   : > { %v326_v55 = vadd.f32 %v325_v52, %v324_v51  ;;  %v353_v26 = vadd.f32 %v527_v25, %v350_v24 }
  0x1d   : > { %v309_v32 = vadd.f32 %v308_v29, %v307_v30 }
  0x1e   : > { %v328_v60 = vadd.f32 %v327_v54, %v326_v55  ;;  %354 = vst [vmem:[#allocation3] sm:$0x3] %v353_v26 }
  0x1f   : > { %v311_v34 = vadd.f32 %v310_v31, %v309_v32 }
  0x20   : > { %v330_v2 = vadd.f32 %v329_v58, %v328_v60 }
  0x21   : > { %v313_v35 = vadd.f32 %v312_v33, %v311_v34 }
  0x22   : > { %v332_v7 = vadd.f32 %v331_v63, %v330_v2 }
  0x23   : > { %v314_v36 = vmax.f32 %v313_v35, 1e-10 }
  0x24   : > { %v334_v9 = vadd.f32 %v333_v5, %v332_v7 }
  0x25   : > { %v315_v37 = vmin.f32 %v314_v36, 1.0 }
  0x27   : > { %v319_v38 = vsub.f32 1.0, %v315_v37  ;;  %632 = vlog2.f32 %v315_v37 }
  0x29   : > { %v734_v39 = vmax.f32 %v319_v38, 0.0 }
  0x2b   : > { %v737_v40 = vand.u32 2147483647, %v734_v39  ;;  %vm583_vm14 = vcmp.lt.f32.partialorder %v734_v39, 0  ;;  %vm584_vm15 = vcmp.eq.f32.partialorder %v734_v39, 0  ;;  %vm596_vm1 = vcmp.ne.f32.partialorder %v734_v39, %v734_v39 }
  0x2c   : > { %vm585_vm2 = vcmp.eq.f32.partialorder %v734_v39, 1065353216 }
  0x2d   : > { %v542_v41 = vand.u32 8388607, %v737_v40  ;;  %v538_v50 = vand.u32 2139095040, %v737_v40  ;;  %vm576_vm9 = vweird.f32 %v737_v40  ;;  %vm575_vm11 = vcmp.lt.f32.partialorder %v737_v40, 0.0  ;;  %v633_v32 = vpop.eup %632 }
  0x2e   : > { %vm574_vm12 = vcmp.eq.f32.partialorder %v737_v40, 0.0  ;;  %vm573_vm13 = vcmp.eq.f32.partialorder %v737_v40, 1.0  ;;  %v317_v33 = vmul.f32 0.6931472, %v633_v32  ;;  %vm588_vm0 = vcmp.eq.f32.partialorder %v737_v40, 2139095040 }
  0x2f   : > { %v543_v42 = vor.u32 8388608, %v542_v41  ;;  %v539_v59 = vshrl.u32 %v538_v50, 23 }
  0x30   : > { %v318_v37 = vsub.f32 0.0, %v317_v33 }
  0x31   : > { %v545_v43 = vand.u32 8388607, %v543_v42  ;;  %v601_v6 = vadd.s32 4294967169, %v539_v59 }
  0x33   : > { %v546_v44 = vor.u32 1065353216, %v545_v43  ;;  %v550_v14 = vadd.s32 1, %v601_v6 }
  0x35   : > { %vm547_vm8 = vcmp.ge.f32.partialorder %v546_v44, 1.4142135  ;;  %v548_v45 = vmul.f32 0.5, %v546_v44 }
  0x36   : > { %v551_v19 = vsel %vm547_vm8, %v550_v14, %v601_v6 }
  0x37   : > { %v549_v48 = vsel %vm547_vm8, %v548_v45, %v546_v44  ;;  %v571_v21 = vcvt.s32.f32 %v551_v19  ;;  %v346_v44 = vld [vmem:[#allocation2] sm:$0x3] }
  0x38   : > { %v602_v49 = vadd.f32 -1.0, %v549_v48  ;;  %v389_v48 = vld [vmem:[#allocation3] sm:$0x3] }
  0x39   : > { %v390_v39 = vsel %vm300_vm6, %v389_v48, 0.0 }
  0x3a   : > { %v553_v53 = vmul.f32 %v602_v49, %v602_v49 }
  0x3c   : > { %v554_v56 = vmul.f32 0.12621109, %v553_v53  ;;  %v556_v57 = vmul.f32 -0.20706727, %v553_v53 }
  0x3e   : > { %v555_v61 = vadd.f32 0.21545328, %v554_v56  ;;  %v557_v62 = vadd.f32 -0.23896284, %v556_v57 }
  0x40   : > { %v558_v3 = vmul.f32 %v555_v61, %v553_v53  ;;  %v560_v4 = vmul.f32 %v557_v62, %v553_v53 }
  0x42   : > { %v559_v8 = vadd.f32 0.28795174, %v558_v3  ;;  %v561_v12 = vadd.f32 -0.3607037, %v560_v4 }
  0x44   : > { %v562_v13 = vmul.f32 %v559_v8, %v553_v53  ;;  %v564_v10 = vmul.f32 %v561_v12, %v553_v53 }
  0x46   : > { %v563_v16 = vadd.f32 0.48090908, %v562_v13  ;;  %v565_v17 = vadd.f32 -0.72134733, %v564_v10 }
  0x48   : > { %v566_v11 = vmul.f32 %v563_v16, %v553_v53  ;;  %v568_v18 = vmul.f32 %v602_v49, %v565_v17 }
  0x4a   : > { %v567_v20 = vadd.f32 1.442695, %v566_v11 }
  0x4c   : > { %v569_v15 = vadd.f32 %v568_v18, %v567_v20 }
  0x4e   : > { %v570_v23 = vmul.f32 %v602_v49, %v569_v15 }
  0x50   : > { %v572_v22 = vadd.f32 %v571_v21, %v570_v23 }
  0x52   : > { %v577_v27 = vsel %vm576_vm9, %v737_v40, %v572_v22 }
  0x53   : > { %v578_v28 = vsel %vm575_vm11, nan, %v577_v27 }
  0x54   : > { %v579_v29 = vsel %vm574_vm12, -inf, %v578_v28 }
  0x55   : > { %v580_v30 = vsel %vm573_vm13, 0.0, %v579_v29 }
  0x56   : > { %v581_v31 = vmul.f32 1.2, %v580_v30 }
  0x58   : > { %634 = vpow2.f32 %v581_v31 }
  0x5e   : > { %v635_v0 = vpop.eup %634 }
  0x5f   : > { %v589_v34 = vsel %vm583_vm14, 2143289344, %v635_v0 }
  0x60   : > { %v590_v35 = vsel %vm584_vm15, 0, %v589_v34 }
  0x61   : > { %v595_v36 = vsel %vm588_vm0, 2139095040, %v590_v35 }
  0x62   : > { %v599_v38 = vsel %vm596_vm1, 2143289344, %v595_v36 }
  0x63   : > { %v600_v41 = vsel %vm585_vm2, 1065353216, %v599_v38 }
  0x64   : > { %v335_v42 = vmul.f32 %v600_v41, %v334_v9 }
  0x66   : > { %v336_v43 = vmul.f32 %v335_v42, %v318_v37 }
  0x68   : > { %v347_v45 = vsel %vm337_vm10, %v336_v43, 0.0 }
  0x69   : > { %v348_v46 = vadd.f32 %v347_v45, %v346_v44 }
  0x6b   : > { %349 = vst [vmem:[#allocation2] sm:$0x3] %v348_v46 }
  0x72   : > { %v376_v40 = vld [vmem:[#allocation2] sm:$0x3] }
  0x73   : > { %v377_v47 = vsel %vm300_vm6, %v376_v40, 0.0 }
  0x74   : > { %378 = vadd.xlane.f32.xlu0 %v377_v47 }
  0x7c   : > { %391 = vadd.xlane.f32.xlu0 %v390_v39 }
  0xe7   : > { %v379_v49 = vpop.xlane.xlu0 %378 }
  0xe8   : > { %v380_v50 = vrot.slane %v379_v49, 4 }
  0xea   : > { %v381_v51 = vadd.f32 %v380_v50, %v379_v49 }
  0xec   : > { %v382_v52 = vrot.slane %v381_v51, 2 }
  0xee   : > { %v383_v53 = vadd.f32 %v382_v52, %v381_v51 }
  0xef   : > { %v392_v54 = vpop.xlane.xlu0 %391 }
  0xf0   : > { %v393_v1 = vrot.slane %v392_v54, 4  ;;  %v384_v55 = vrot.slane %v383_v53, 1 }
  0xf2   : > { %v394_v56 = vadd.f32 %v393_v1, %v392_v54  ;;  %v385_v57 = vadd.f32 %v384_v55, %v383_v53 }
  0xf4   : > { %v395_v58 = vrot.slane %v394_v56, 2  ;;  %603 = vpush %v385_v57 }
  0xf6   : > { %v396_v59 = vadd.f32 %v395_v58, %v394_v56 }
  0xf8   : > { %v397_v60 = vrot.slane %v396_v59, 1 }
  0xfa   : > { %v398_v61 = vadd.f32 %v397_v60, %v396_v59 }
  0xfc   : > { %605 = vpush %v398_v61 }
 0x125   : > { %s604_s27 = spop %603 }
 0x126   : > { %v387_v62 = vstv %s604_s27 }
 0x127   : > { %388 = vst [vmem:[%s251_s26] sm:$0x1] %v387_v62 }
 0x12d   : > { %s606_s4 = spop %605 }
 0x12e   : > { %v400_v63 = vstv %s606_s4 }
 0x12f   : > { %401 = vst [vmem:[%s256_s30] sm:$0x1] %v400_v63 }
 0x130 PF: > { %s14_s14 = sadd.s32 1, %s658_s14   ;;  %s783_s12 = smov %s654_s13 }
 0x131   : > { %p11_p5 = scmp.ge.s32.totalorder %s14_s14, 4   ;;  %s784_s13 = smov %s786_s15 }
 0x133   :  { %13 = sbr.rel (!%p11_p5) target bundleno = 2 (0x2), region = 89 }

</bundles_post_ra>
